<compile_context>
chip_gen: v7x
topology: tpu7x:2x2x1
jax: 0.10.0
libtpu: 0.0.40
codegen_flags: <defaults>
</compile_context>

<pallas_src>
import functools

import jax
import jax.numpy as jnp
from jax.experimental import pallas as pl
from jax.experimental.pallas import tpu as pltpu


def _conv_taps_kernel(x_ref, w_ref, b_ref, o_ref, *, ksize, wpad):
    # x_ref: (C_in, pad_len)      bf16  zero-padded activation, rows flattened row-major
    # w_ref: (K*K, C_out, C_in)   bf16  w_ref[t][o, i] = weight[o, i, kh, kw], t = kh*K + kw
    # b_ref: (C_out, 1)           f32
    # o_ref: (C_out, N)           f32   lane-dense "wide" NCHW output (N multiple of 128)
    n = o_ref.shape[-1]
    acc = jnp.zeros(o_ref.shape, jnp.float32)
    for t in range(ksize * ksize):              # K*K = 9, unrolled at trace time
        kh, kw = divmod(t, ksize)
        off = kh * wpad + kw                    # static lane offset of this tap
        tap = x_ref[:, off:off + n]             # (C_in, N) bf16, static slice
        acc = acc + jnp.dot(w_ref[t], tap, preferred_element_type=jnp.float32)
    o_ref[...] = acc + b_ref[...]               # (C_out, 1) broadcast along lanes (VPU)


def reshape_conv_forward(x, weight, bias, in_img_dim, in_channels, out_channels,
                         kernel_size=3, padding=1):
    H = W = in_img_dim
    C_in, C_out, K, P = in_channels, out_channels, kernel_size, padding

    # glue: x.view(1, C_in, H, W) (NCHW), zero-pad spatially, flatten rows (row-major).
    x_img = x.reshape(C_in, H, W).astype(jnp.float32)
    Hp, Wp = H + 2 * P, W + 2 * P
    x_pad = jnp.pad(x_img, ((0, 0), (P, P), (P, P)))             # (C_in, Hp, Wp)
    flat_len = Hp * Wp

    n_wide = H * Wp                                              # valid wide-output width
    n_out = ((n_wide + 127) // 128) * 128                        # lane-dense output width
    max_off = (K - 1) * Wp + (K - 1)
    pad_len = ((max(max_off + n_out, flat_len) + 127) // 128) * 128

    x_flat = jnp.pad(x_pad.reshape(C_in, flat_len),
                     ((0, 0), (0, pad_len - flat_len))).astype(jnp.bfloat16)

    # glue: weight (C_out, C_in, K, K) -> (K*K, C_out, C_in); bias -> (C_out, 1)
    w_taps = weight.transpose(2, 3, 0, 1).reshape(K * K, C_out, C_in).astype(jnp.bfloat16)
    b2d = bias.reshape(C_out, 1).astype(jnp.float32)

    kernel = functools.partial(_conv_taps_kernel, ksize=K, wpad=Wp)
    out_pad = pl.pallas_call(
        kernel,
        out_shape=jax.ShapeDtypeStruct((C_out, n_out), jnp.float32),
        grid=(1,),
        in_specs=[
            pl.BlockSpec((C_in, pad_len), lambda i: (0, 0)),
            pl.BlockSpec((K * K, C_out, C_in), lambda i: (0, 0, 0)),
            pl.BlockSpec((C_out, 1), lambda i: (0, 0)),
        ],
        out_specs=pl.BlockSpec((C_out, n_out), lambda i: (0, 0)),
        compiler_params=pltpu.CompilerParams(dimension_semantics=("arbitrary",)),
    )(x_flat, w_taps, b2d)

    # glue: drop the lane/W padding columns; (C_out, H, W) is already NCHW order -> flatten.
    out_nchw = out_pad[:, :n_wide].reshape(C_out, H, Wp)[:, :, :W]
    return out_nchw.reshape(-1)


if __name__ == "__main__":
    in_img_dim = 16
    C_in, C_out, K = 4, 8, 3

    key = jax.random.PRNGKey(0)
    kx, kw, kb = jax.random.split(key, 3)
    # x holds exactly C_in * H * H elements (matching x.view(1, C_in, H, H))
    x = jax.random.normal(kx, (C_in, in_img_dim, in_img_dim), jnp.float32)
    fan_in = C_in * K * K
    weight = jax.random.normal(kw, (C_out, C_in, K, K), jnp.float32) / jnp.sqrt(fan_in)
    bias = 0.1 * jax.random.normal(kb, (C_out,), jnp.float32)

    out = reshape_conv_forward(x, weight, bias, in_img_dim, C_in, C_out, K, 1)
    out = jax.block_until_ready(out)

    # pure-JAX f32 reference (NCHW / OIHW conv), flattened the same way as torch.flatten
    ref = jax.lax.conv_general_dilated(
        x.reshape(1, C_in, in_img_dim, in_img_dim), weight,
        window_strides=(1, 1), padding=((1, 1), (1, 1)),
        dimension_numbers=("NCHW", "OIHW", "NCHW"),
    ) + bias.reshape(1, C_out, 1, 1)
    ref = ref.reshape(-1)

    assert out.shape == ref.shape
    # bf16 operands (f32 accumulation) vs f32 reference -> loosened tolerance.
    max_err = float(jnp.max(jnp.abs(out - ref)))
    assert jnp.allclose(out, ref, atol=2e-2, rtol=2e-2), max_err
    print("KERNEL_OK")
</pallas_src>

<mosaic_0001>
module attributes {stable_mosaic.version = 11 : i64} {
  func.func @_conv_taps_kernel(%arg0: i32, %arg1: memref<4x512xbf16, #tpu.memory_space<vmem>>, %arg2: memref<9x8x4xbf16, #tpu.memory_space<vmem>>, %arg3: memref<8x1xf32, #tpu.memory_space<vmem>>, %arg4: memref<8x384xf32, #tpu.memory_space<vmem>>) attributes {dimension_semantics = [#tpu.dimension_semantics<arbitrary>], iteration_bounds = array<i64: 1>, scalar_prefetch = 0 : i64, scratch_operands = 0 : i64, tpu.core_type = #tpu.core_type<tc>, window_params = [{pipeline_mode = #tpu.pipeline_mode<synchronous>, transform_indices = @transform_0, window_bounds = array<i64: 4, 512>}, {pipeline_mode = #tpu.pipeline_mode<synchronous>, transform_indices = @transform_1, window_bounds = array<i64: 9, 8, 4>}, {pipeline_mode = #tpu.pipeline_mode<synchronous>, transform_indices = @transform_2, window_bounds = array<i64: 8, 1>}, {pipeline_mode = #tpu.pipeline_mode<synchronous>, transform_indices = @transform_3, window_bounds = array<i64: 8, 384>}]} {
    %cst = arith.constant 0.000000e+00 : f32
    %0 = vector.broadcast %cst : f32 to vector<8x384xf32>
    %c0 = arith.constant 0 : index
    %c0_0 = arith.constant 0 : index
    %1 = vector.load %arg1[%c0, %c0_0] : memref<4x512xbf16, #tpu.memory_space<vmem>>, vector<4x384xbf16>
    %c0_1 = arith.constant 0 : index
    %c0_2 = arith.constant 0 : index
    %c0_3 = arith.constant 0 : index
    %2 = vector.load %arg2[%c0_1, %c0_2, %c0_3] : memref<9x8x4xbf16, #tpu.memory_space<vmem>>, vector<1x8x4xbf16>
    %3 = vector.shape_cast %2 : vector<1x8x4xbf16> to vector<8x4xbf16>
    %cst_4 = arith.constant dense<0.000000e+00> : vector<8x384xf32>
    %4 = tpu.matmul %3, %1, %cst_4 {dimension_numbers = #tpu.dot_dimension_numbers<[1], [0], [0], [1], [0, 0, 1, 1], [], []>} : vector<8x4xbf16>, vector<4x384xbf16>, vector<8x384xf32> -> vector<8x384xf32>
    %5 = arith.addf %0, %4 : vector<8x384xf32>
    %c0_5 = arith.constant 0 : index
    %c1 = arith.constant 1 : index
    %6 = vector.load %arg1[%c0_5, %c1] : memref<4x512xbf16, #tpu.memory_space<vmem>>, vector<4x384xbf16>
    %c1_6 = arith.constant 1 : index
    %c0_7 = arith.constant 0 : index
    %c0_8 = arith.constant 0 : index
    %7 = vector.load %arg2[%c1_6, %c0_7, %c0_8] : memref<9x8x4xbf16, #tpu.memory_space<vmem>>, vector<1x8x4xbf16>
    %8 = vector.shape_cast %7 : vector<1x8x4xbf16> to vector<8x4xbf16>
    %cst_9 = arith.constant dense<0.000000e+00> : vector<8x384xf32>
    %9 = tpu.matmul %8, %6, %cst_9 {dimension_numbers = #tpu.dot_dimension_numbers<[1], [0], [0], [1], [0, 0, 1, 1], [], []>} : vector<8x4xbf16>, vector<4x384xbf16>, vector<8x384xf32> -> vector<8x384xf32>
    %10 = arith.addf %5, %9 : vector<8x384xf32>
    %c0_10 = arith.constant 0 : index
    %c2 = arith.constant 2 : index
    %11 = vector.load %arg1[%c0_10, %c2] : memref<4x512xbf16, #tpu.memory_space<vmem>>, vector<4x384xbf16>
    %c2_11 = arith.constant 2 : index
    %c0_12 = arith.constant 0 : index
    %c0_13 = arith.constant 0 : index
    %12 = vector.load %arg2[%c2_11, %c0_12, %c0_13] : memref<9x8x4xbf16, #tpu.memory_space<vmem>>, vector<1x8x4xbf16>
    %13 = vector.shape_cast %12 : vector<1x8x4xbf16> to vector<8x4xbf16>
    %cst_14 = arith.constant dense<0.000000e+00> : vector<8x384xf32>
    %14 = tpu.matmul %13, %11, %cst_14 {dimension_numbers = #tpu.dot_dimension_numbers<[1], [0], [0], [1], [0, 0, 1, 1], [], []>} : vector<8x4xbf16>, vector<4x384xbf16>, vector<8x384xf32> -> vector<8x384xf32>
    %15 = arith.addf %10, %14 : vector<8x384xf32>
    %c0_15 = arith.constant 0 : index
    %c18 = arith.constant 18 : index
    %16 = vector.load %arg1[%c0_15, %c18] : memref<4x512xbf16, #tpu.memory_space<vmem>>, vector<4x384xbf16>
    %c3 = arith.constant 3 : index
    %c0_16 = arith.constant 0 : index
    %c0_17 = arith.constant 0 : index
    %17 = vector.load %arg2[%c3, %c0_16, %c0_17] : memref<9x8x4xbf16, #tpu.memory_space<vmem>>, vector<1x8x4xbf16>
    %18 = vector.shape_cast %17 : vector<1x8x4xbf16> to vector<8x4xbf16>
    %cst_18 = arith.constant dense<0.000000e+00> : vector<8x384xf32>
    %19 = tpu.matmul %18, %16, %cst_18 {dimension_numbers = #tpu.dot_dimension_numbers<[1], [0], [0], [1], [0, 0, 1, 1], [], []>} : vector<8x4xbf16>, vector<4x384xbf16>, vector<8x384xf32> -> vector<8x384xf32>
    %20 = arith.addf %15, %19 : vector<8x384xf32>
    %c0_19 = arith.constant 0 : index
    %c19 = arith.constant 19 : index
    %21 = vector.load %arg1[%c0_19, %c19] : memref<4x512xbf16, #tpu.memory_space<vmem>>, vector<4x384xbf16>
    %c4 = arith.constant 4 : index
    %c0_20 = arith.constant 0 : index
    %c0_21 = arith.constant 0 : index
    %22 = vector.load %arg2[%c4, %c0_20, %c0_21] : memref<9x8x4xbf16, #tpu.memory_space<vmem>>, vector<1x8x4xbf16>
    %23 = vector.shape_cast %22 : vector<1x8x4xbf16> to vector<8x4xbf16>
    %cst_22 = arith.constant dense<0.000000e+00> : vector<8x384xf32>
    %24 = tpu.matmul %23, %21, %cst_22 {dimension_numbers = #tpu.dot_dimension_numbers<[1], [0], [0], [1], [0, 0, 1, 1], [], []>} : vector<8x4xbf16>, vector<4x384xbf16>, vector<8x384xf32> -> vector<8x384xf32>
    %25 = arith.addf %20, %24 : vector<8x384xf32>
    %c0_23 = arith.constant 0 : index
    %c20 = arith.constant 20 : index
    %26 = vector.load %arg1[%c0_23, %c20] : memref<4x512xbf16, #tpu.memory_space<vmem>>, vector<4x384xbf16>
    %c5 = arith.constant 5 : index
    %c0_24 = arith.constant 0 : index
    %c0_25 = arith.constant 0 : index
    %27 = vector.load %arg2[%c5, %c0_24, %c0_25] : memref<9x8x4xbf16, #tpu.memory_space<vmem>>, vector<1x8x4xbf16>
    %28 = vector.shape_cast %27 : vector<1x8x4xbf16> to vector<8x4xbf16>
    %cst_26 = arith.constant dense<0.000000e+00> : vector<8x384xf32>
    %29 = tpu.matmul %28, %26, %cst_26 {dimension_numbers = #tpu.dot_dimension_numbers<[1], [0], [0], [1], [0, 0, 1, 1], [], []>} : vector<8x4xbf16>, vector<4x384xbf16>, vector<8x384xf32> -> vector<8x384xf32>
    %30 = arith.addf %25, %29 : vector<8x384xf32>
    %c0_27 = arith.constant 0 : index
    %c36 = arith.constant 36 : index
    %31 = vector.load %arg1[%c0_27, %c36] : memref<4x512xbf16, #tpu.memory_space<vmem>>, vector<4x384xbf16>
    %c6 = arith.constant 6 : index
    %c0_28 = arith.constant 0 : index
    %c0_29 = arith.constant 0 : index
    %32 = vector.load %arg2[%c6, %c0_28, %c0_29] : memref<9x8x4xbf16, #tpu.memory_space<vmem>>, vector<1x8x4xbf16>
    %33 = vector.shape_cast %32 : vector<1x8x4xbf16> to vector<8x4xbf16>
    %cst_30 = arith.constant dense<0.000000e+00> : vector<8x384xf32>
    %34 = tpu.matmul %33, %31, %cst_30 {dimension_numbers = #tpu.dot_dimension_numbers<[1], [0], [0], [1], [0, 0, 1, 1], [], []>} : vector<8x4xbf16>, vector<4x384xbf16>, vector<8x384xf32> -> vector<8x384xf32>
    %35 = arith.addf %30, %34 : vector<8x384xf32>
    %c0_31 = arith.constant 0 : index
    %c37 = arith.constant 37 : index
    %36 = vector.load %arg1[%c0_31, %c37] : memref<4x512xbf16, #tpu.memory_space<vmem>>, vector<4x384xbf16>
    %c7 = arith.constant 7 : index
    %c0_32 = arith.constant 0 : index
    %c0_33 = arith.constant 0 : index
    %37 = vector.load %arg2[%c7, %c0_32, %c0_33] : memref<9x8x4xbf16, #tpu.memory_space<vmem>>, vector<1x8x4xbf16>
    %38 = vector.shape_cast %37 : vector<1x8x4xbf16> to vector<8x4xbf16>
    %cst_34 = arith.constant dense<0.000000e+00> : vector<8x384xf32>
    %39 = tpu.matmul %38, %36, %cst_34 {dimension_numbers = #tpu.dot_dimension_numbers<[1], [0], [0], [1], [0, 0, 1, 1], [], []>} : vector<8x4xbf16>, vector<4x384xbf16>, vector<8x384xf32> -> vector<8x384xf32>
    %40 = arith.addf %35, %39 : vector<8x384xf32>
    %c0_35 = arith.constant 0 : index
    %c38 = arith.constant 38 : index
    %41 = vector.load %arg1[%c0_35, %c38] : memref<4x512xbf16, #tpu.memory_space<vmem>>, vector<4x384xbf16>
    %c8 = arith.constant 8 : index
    %c0_36 = arith.constant 0 : index
    %c0_37 = arith.constant 0 : index
    %42 = vector.load %arg2[%c8, %c0_36, %c0_37] : memref<9x8x4xbf16, #tpu.memory_space<vmem>>, vector<1x8x4xbf16>
    %43 = vector.shape_cast %42 : vector<1x8x4xbf16> to vector<8x4xbf16>
    %cst_38 = arith.constant dense<0.000000e+00> : vector<8x384xf32>
    %44 = tpu.matmul %43, %41, %cst_38 {dimension_numbers = #tpu.dot_dimension_numbers<[1], [0], [0], [1], [0, 0, 1, 1], [], []>} : vector<8x4xbf16>, vector<4x384xbf16>, vector<8x384xf32> -> vector<8x384xf32>
    %45 = arith.addf %40, %44 : vector<8x384xf32>
    %c0_39 = arith.constant 0 : index
    %c0_40 = arith.constant 0 : index
    %46 = vector.load %arg3[%c0_39, %c0_40] : memref<8x1xf32, #tpu.memory_space<vmem>>, vector<8x1xf32>
    %47 = vector.broadcast %46 : vector<8x1xf32> to vector<8x384xf32>
    %48 = arith.addf %45, %47 : vector<8x384xf32>
    %c0_41 = arith.constant 0 : index
    %c0_42 = arith.constant 0 : index
    %49 = vector.load %arg4[%c0_41, %c0_42] : memref<8x384xf32, #tpu.memory_space<vmem>>, vector<8x384xf32>
    tpu.vector_store %arg4[%c0_41, %c0_42], %48 {strides = array<i32>} : memref<8x384xf32, #tpu.memory_space<vmem>>, vector<8x384xf32>,
    return
  }
  func.func @transform_0(%arg0: i32) -> (i32, i32) {
    %c0_i32 = arith.constant 0 : i32
    %c0_i32_0 = arith.constant 0 : i32
    %c0_i32_1 = arith.constant 0 : i32
    return %c0_i32, %c0_i32_0 : i32, i32
  }
  func.func @transform_1(%arg0: i32) -> (i32, i32, i32) {
    %c0_i32 = arith.constant 0 : i32
    %c0_i32_0 = arith.constant 0 : i32
    %c0_i32_1 = arith.constant 0 : i32
    %c0_i32_2 = arith.constant 0 : i32
    return %c0_i32, %c0_i32_0, %c0_i32_1 : i32, i32, i32
  }
  func.func @transform_2(%arg0: i32) -> (i32, i32) {
    %c0_i32 = arith.constant 0 : i32
    %c0_i32_0 = arith.constant 0 : i32
    %c0_i32_1 = arith.constant 0 : i32
    return %c0_i32, %c0_i32_0 : i32, i32
  }
  func.func @transform_3(%arg0: i32) -> (i32, i32) {
    %c0_i32 = arith.constant 0 : i32
    %c0_i32_0 = arith.constant 0 : i32
    %c0_i32_1 = arith.constant 0 : i32
    return %c0_i32, %c0_i32_0 : i32, i32
  }
}

</mosaic_0001>

<bundles_post_ra>
// kernel: tpu_custom_call.1
= control target key start
LH: loop header
LB: loop body
LE: loop exit
PB: predicated region body
PF: predicated region fallthrough
CT: control target
= control target key end

     0   :  { %v26_v1 = vlaneseq  ;;  %v1332_v2 = vmov 1983009808   ;;  %s1495_s0 = inlined_call_operand.vmem [shape: bf16[4,512], index: 0, kind: input, shape index: {}]   ;;  %s1496_s1 = inlined_call_operand.vmem [shape: bf16[9,8,4], index: 1, kind: input, shape index: {}]   ;;  %s1497_s2 = inlined_call_operand.vmem [shape: f32[8,1], index: 2, kind: input, shape index: {}]   ;;  %s1498_s3 = inlined_call_operand.hbm [shape: f32[8,384], index: 3, kind: output, shape index: {}]  }
   0x1   :  { %v18_v0 = vld [vmem:[%s1495_s0] sm:$0xff]  ;;  %v24_v3 = vunpack.c.l.s4 %v1332_v2 }
   0x2   :  { %8 = vsyncpa [#allocation3], 0  ;;  %v27_v4 = vshrl.u32 %v26_v1, 7  ;;  %v1333_v5 = vmov 0.0   ;;  %v22_v7 = vcombine.high %v18_v0, %v18_v0  ;;  %v1334_v8 = vmov 0   ;;  %s1336_s14 = smov 127  }
   0x3   :  { %1238 = vmatprep.subr.bf16.mxu1 %v1333_v5  ;;  %v25_v6 = vunpack.c.0.s8 %v24_v3  ;;  %97 = vmatprep.mubr.bf16.mxu0 %v1334_v8  ;;  %vm1335_vm0 = vmmov 0   ;;  %s1337_s15 = smov 126   ;;  %s1338_s16 = smov 110   ;;  %v1159_v14 = vld [vmem:[%s1497_s2] sm:$0xff]  ;;  %vm47_vm1 = vcmask 1039360   ;;  %vm55_vm2 = vcmask 1041408  }
   0x4   :  { %1240 = vmatprep.mubr.msk.bf16.mxu1 %vm1335_vm0, %v1333_v5  ;;  %1305 = vset.pattern.permute.xlu0 %v1334_v8  ;;  %s1339_s17 = smov 109   ;;  %s1340_s18 = smov 108   ;;  %v16_v15 = vld [vmem:[%s1495_s0] sm:$0x3f]  ;;  %vm51_vm3 = vcmask 31744   ;;  %vm285_vm4 = vcmask 1031168  }
   0x5   :  { %v28_v9 = vsub.s32 %v25_v6, %v27_v4  ;;  %s1341_s19 = smov 92   ;;  %s1342_s20 = smov 91   ;;  %v147_v19 = vcombine.high %v16_v15, %v16_v15  ;;  %v1185_v29 = vld [vmem:[%s1496_s1 + $0x4] sm:$0xf]  ;;  %v17_v39 = vld [vmem:[%s1496_s1] sm:$0xf] }
   0x6   :  { %s1343_s21 = smov 90   ;;  %vm414_vm5 = vcmask 900096   ;;  %v1192_v49 = vld [vmem:[%s1496_s1 + $0x8] sm:$0xf]  ;;  %vm543_vm6 = vcmask 891904   ;;  %vm672_vm7 = vcmask 883712  }
   0x7   :  { %v29_v10 = vrot.slane %v18_v0, %v28_v9  ;;  %v36_v11 = vrot.slane %v22_v7, %v28_v9  ;;  %v154_v18 = vrot.slane %v16_v15, %v28_v9  ;;  %v161_v23 = vrot.slane %v147_v19, %v28_v9  ;;  %v1196_v59 = vld [vmem:[%s1496_s1 + $0xc] sm:$0xf]  ;;  %v1200_v6 = vld [vmem:[%s1496_s1 + $0x10] sm:$0xf] }
   0x8   :  { %vm801_vm8 = vcmask 752640   ;;  %vm930_vm9 = vcmask 744448   ;;  %vm1059_vm10 = vcmask 736256  }
   0x9   :  { %39 = vrot.lane.b32.xlu0 %v29_v10, %s1336_s14  ;;  %v37_v12 = vcombine.high %v29_v10, %v29_v10  ;;  %43 = vrot.lane.b32.xlu1 %v36_v11, %s1336_s14  ;;  %v38_v13 = vcombine.high %v36_v11, %v36_v11  ;;  %v162_v22 = vcombine.high %v154_v18, %v154_v18  ;;  %v167_v31 = vsel %vm55_vm2, %v154_v18, 0 }
   0xa   :  { %v173_v33 = vsel %vm55_vm2, %v161_v23, 0 }
   0xd   :  { %41 = vrot.lane.b32.xlu0 %v37_v12, %s1336_s14  ;;  %45 = vrot.lane.b32.xlu1 %v38_v13, %s1336_s14 }
  0x11   :  { %277 = vrot.lane.b32.xlu0 %v29_v10, %s1337_s15  ;;  %279 = vrot.lane.b32.xlu1 %v37_v12, %s1337_s15 }
  0x15   :  { %281 = vrot.lane.b32.xlu0 %v36_v11, %s1337_s15  ;;  %283 = vrot.lane.b32.xlu1 %v38_v13, %s1337_s15 }
  0x19   :  { %406 = vrot.lane.b32.xlu0 %v29_v10, %s1338_s16  ;;  %408 = vrot.lane.b32.xlu1 %v37_v12, %s1338_s16 }
  0x1d   :  { %410 = vrot.lane.b32.xlu0 %v36_v11, %s1338_s16  ;;  %412 = vrot.lane.b32.xlu1 %v38_v13, %s1338_s16 }
  0x21   :  { %535 = vrot.lane.b32.xlu0 %v29_v10, %s1339_s17  ;;  %537 = vrot.lane.b32.xlu1 %v37_v12, %s1339_s17 }
  0x25   :  { %539 = vrot.lane.b32.xlu0 %v36_v11, %s1339_s17  ;;  %541 = vrot.lane.b32.xlu1 %v38_v13, %s1339_s17 }
  0x29   :  { %664 = vrot.lane.b32.xlu0 %v29_v10, %s1340_s18  ;;  %666 = vrot.lane.b32.xlu1 %v37_v12, %s1340_s18 }
  0x2d   :  { %668 = vrot.lane.b32.xlu0 %v36_v11, %s1340_s18  ;;  %670 = vrot.lane.b32.xlu1 %v38_v13, %s1340_s18 }
  0x31   :  { %793 = vrot.lane.b32.xlu0 %v29_v10, %s1341_s19  ;;  %795 = vrot.lane.b32.xlu1 %v37_v12, %s1341_s19 }
  0x35   :  { %797 = vrot.lane.b32.xlu0 %v36_v11, %s1341_s19  ;;  %799 = vrot.lane.b32.xlu1 %v38_v13, %s1341_s19 }
  0x39   :  { %922 = vrot.lane.b32.xlu0 %v29_v10, %s1342_s20  ;;  %924 = vrot.lane.b32.xlu1 %v37_v12, %s1342_s20 }
  0x3d   :  { %926 = vrot.lane.b32.xlu0 %v36_v11, %s1342_s20  ;;  %928 = vrot.lane.b32.xlu1 %v38_v13, %s1342_s20 }
  0x41   :  { %1051 = vrot.lane.b32.xlu0 %v29_v10, %s1343_s21  ;;  %1053 = vrot.lane.b32.xlu1 %v37_v12, %s1343_s21 }
  0x45   :  { %1055 = vrot.lane.b32.xlu0 %v36_v11, %s1343_s21  ;;  %1057 = vrot.lane.b32.xlu1 %v38_v13, %s1343_s21 }
  0x49   :  { %1162 = vperm.xlu0 %1305, %v1159_v14  }
  0x7b   :  { %v40_v16 = vpop.permute.xlu0 %39  ;;  %v44_v17 = vpop.permute.xlu1 %43 }
  0x7f   :  { %v42_v20 = vpop.permute.xlu0 %41  ;;  %v46_v21 = vpop.permute.xlu1 %45 }
  0x80   :  { %v49_v24 = vsel %vm47_vm1, %v42_v20, %v44_v17  ;;  %v48_v25 = vsel %vm47_vm1, %v40_v16, %v42_v20  ;;  %v50_v26 = vsel %vm47_vm1, %v44_v17, %v46_v21  ;;  %v1204_v17 = vld [vmem:[%s1496_s1 + $0x14] sm:$0xf] }
  0x81   :  { %1186 = vmatprep.subr.msk.bf16.mxu0 %vm55_vm2, %v49_v24  ;;  %v57_v27 = vsel %vm55_vm2, %v48_v25, 0  ;;  %v63_v28 = vsel %vm55_vm2, %v50_v26, 0 }
  0x82   :  { %66 = vmatpush1.bf16.msra.mxu0 %v57_v27  ;;  %1239 = vmatpush3.bf16.msra.mxu1 %v63_v28  ;;  %v1208_v27 = vld [vmem:[%s1496_s1 + $0x18] sm:$0xf] }
  0x83   :  { %v278_v30 = vpop.permute.xlu0 %277  ;;  %1189 = vmatprep.subr.msk.bf16.mxu0 %vm55_vm2, %v162_v22  ;;  %1244 = vmatprep.subr.bf16.mxu1 %v1333_v5  ;;  %v280_v32 = vpop.permute.xlu1 %279 }
  0x84   :  { %v286_v36 = vsel %vm285_vm4, %v278_v30, %v280_v32 }
  0x85   :  { %1187 = vmatmul.mubr.msk.bf16.vlgmr.msra.gmra.mrb[0].mxu0 %vm51_vm3, %v1185_v29  ;;  %1241 = vmatmul.mubr.msk.bf16.vlgmr.msra.gmra.mrb[0].mxu1 %vm51_vm3, %v1185_v29  ;;  %v293_v40 = vsel %vm55_vm2, %v286_v36, 0 }
  0x86   :  { %176 = vmatpush1.bf16.msra.mxu0 %v167_v31  ;;  %1245 = vmatpush3.bf16.msra.mxu1 %v173_v33 }
  0x87   :  { %v282_v34 = vpop.permute.xlu0 %281  ;;  %v284_v35 = vpop.permute.xlu1 %283  ;;  %207 = vmatprep.mubr.bf16.mxu0 %v1334_v8  ;;  %1246 = vmatprep.mubr.msk.bf16.mxu1 %vm1335_vm0, %v1333_v5 }
  0x88   :  { %v287_v37 = vsel %vm285_vm4, %v280_v32, %v282_v34  ;;  %v288_v38 = vsel %vm285_vm4, %v282_v34, %v284_v35  ;;  %1250 = vmatprep.subr.bf16.mxu1 %v1333_v5 }
  0x89   :  { %1193 = vmatprep.subr.msk.bf16.mxu0 %vm55_vm2, %v287_v37  ;;  %v299_v41 = vsel %vm55_vm2, %v288_v38, 0  ;;  %v1212_v37 = vld [vmem:[%s1496_s1 + $0x1c] sm:$0xf] }
  0x8b   :  { %v407_v42 = vpop.permute.xlu0 %406  ;;  %v409_v43 = vpop.permute.xlu1 %408 }
  0x8c   :  { %v415_v46 = vsel %vm414_vm5, %v407_v42, %v409_v43 }
  0x8d   :  { %1190 = vmatmul.mubr.msk.bf16.vlgmr.msra.gmra.mrb[4].mxu0 %vm51_vm3, %v17_v39  ;;  %1247 = vmatmul.mubr.msk.bf16.vlgmr.msra.gmra.mrb[4].mxu1 %vm51_vm3, %v17_v39  ;;  %v422_v50 = vsel %vm55_vm2, %v415_v46, 0 }
  0x8e   :  { %302 = vmatpush1.bf16.msra.mxu0 %v293_v40  ;;  %1251 = vmatpush3.bf16.msra.mxu1 %v299_v41  ;;  %v1216_v40 = vld [vmem:[%s1496_s1 + $0x20] sm:$0xf]  ;;  %s1344_s1 = smov [#allocation2]  }
  0x8f   :  { %v411_v44 = vpop.permute.xlu0 %410  ;;  %v413_v45 = vpop.permute.xlu1 %412  ;;  %333 = vmatprep.mubr.bf16.mxu0 %v1334_v8  ;;  %1252 = vmatprep.mubr.msk.bf16.mxu1 %vm1335_vm0, %v1333_v5  ;;  %s1177_s15 = sshll.u32 %s1344_s1, 4  ;;  %s1178_s15 = int_to_ptr.vmem [resolvable:$true] %s1177_s15 }
  0x90   :  { %v416_v47 = vsel %vm414_vm5, %v409_v43, %v411_v44  ;;  %v417_v48 = vsel %vm414_vm5, %v411_v44, %v413_v45  ;;  %1256 = vmatprep.subr.bf16.mxu1 %v1333_v5  ;;  %s1308_s16 = scalar_lea.vmem %s1178_s15, 384  ;;  %p1313_p1 = scmp.lt.s32.totalorder %s1178_s15, %s1178_s15 }
  0x91   :  { %1197 = vmatprep.subr.msk.bf16.mxu0 %vm55_vm2, %v416_v47  ;;  %v428_v51 = vsel %vm55_vm2, %v417_v48, 0  ;;  %p1309_p0 = scmp.ne.s32.totalorder %s1178_s15, %s1308_s16  ;;  %p1314_p2 = scmp.lt.s32.totalorder %s1308_s16, %s1308_s16 }
  0x93   :  { %v536_v52 = vpop.permute.xlu0 %535  ;;  %v538_v53 = vpop.permute.xlu1 %537  ;;  %p1315_p3 = por %p1314_p2, %p1313_p1 }
  0x94   :  { %v544_v56 = vsel %vm543_vm6, %v536_v52, %v538_v53 }
  0x95   :  { %1194 = vmatmul.mubr.msk.bf16.vlgmr.msra.gmra.mrb[8].mxu0 %vm51_vm3, %v1192_v49  ;;  %1253 = vmatmul.mubr.msk.bf16.vlgmr.msra.gmra.mrb[8].mxu1 %vm51_vm3, %v1192_v49  ;;  %v551_v60 = vsel %vm55_vm2, %v544_v56, 0  ;;  %p1316_p4 = pnand %p1315_p3, %p1309_p0 }
  0x96   :  { %431 = vmatpush1.bf16.msra.mxu0 %v422_v50  ;;  %1257 = vmatpush3.bf16.msra.mxu1 %v428_v51 }
  0x97   :  { %v540_v54 = vpop.permute.xlu0 %539  ;;  %v542_v55 = vpop.permute.xlu1 %541  ;;  %462 = vmatprep.mubr.bf16.mxu0 %v1334_v8  ;;  %1258 = vmatprep.mubr.msk.bf16.mxu1 %vm1335_vm0, %v1333_v5 }
  0x98   :  { %v545_v57 = vsel %vm543_vm6, %v538_v53, %v540_v54  ;;  %v546_v58 = vsel %vm543_vm6, %v540_v54, %v542_v55  ;;  %1262 = vmatprep.subr.bf16.mxu1 %v1333_v5 }
  0x99   :  { %1201 = vmatprep.subr.msk.bf16.mxu0 %vm55_vm2, %v545_v57  ;;  %v557_v61 = vsel %vm55_vm2, %v546_v58, 0 }
  0x9b   :  { %v665_v62 = vpop.permute.xlu0 %664  ;;  %v667_v63 = vpop.permute.xlu1 %666 }
  0x9c   :  { %v673_v2 = vsel %vm672_vm7, %v665_v62, %v667_v63 }
  0x9d   :  { %1198 = vmatmul.mubr.msk.bf16.vlgmr.msra.gmra.mrb[12].mxu0 %vm51_vm3, %v1196_v59  ;;  %1259 = vmatmul.mubr.msk.bf16.vlgmr.msra.gmra.mrb[12].mxu1 %vm51_vm3, %v1196_v59  ;;  %v680_v7 = vsel %vm55_vm2, %v673_v2, 0 }
  0x9e   :  { %560 = vmatpush1.bf16.msra.mxu0 %v551_v60  ;;  %1263 = vmatpush3.bf16.msra.mxu1 %v557_v61 }
  0x9f   :  { %v669_v0 = vpop.permute.xlu0 %668  ;;  %v671_v1 = vpop.permute.xlu1 %670  ;;  %591 = vmatprep.mubr.bf16.mxu0 %v1334_v8  ;;  %1264 = vmatprep.mubr.msk.bf16.mxu1 %vm1335_vm0, %v1333_v5 }
  0xa0   :  { %v674_v3 = vsel %vm672_vm7, %v667_v63, %v669_v0  ;;  %v675_v4 = vsel %vm672_vm7, %v669_v0, %v671_v1  ;;  %1268 = vmatprep.subr.bf16.mxu1 %v1333_v5 }
  0xa1   :  { %1205 = vmatprep.subr.msk.bf16.mxu0 %vm55_vm2, %v674_v3  ;;  %v686_v9 = vsel %vm55_vm2, %v675_v4, 0 }
  0xa3   :  { %v794_v10 = vpop.permute.xlu0 %793  ;;  %v796_v11 = vpop.permute.xlu1 %795 }
  0xa4   :  { %v802_v14 = vsel %vm801_vm8, %v794_v10, %v796_v11 }
  0xa5   :  { %1202 = vmatmul.mubr.msk.bf16.vlgmr.msra.gmra.mrb[16].mxu0 %vm51_vm3, %v1200_v6  ;;  %1265 = vmatmul.mubr.msk.bf16.vlgmr.msra.gmra.mrb[16].mxu1 %vm51_vm3, %v1200_v6  ;;  %v809_v18 = vsel %vm55_vm2, %v802_v14, 0 }
  0xa6   :  { %689 = vmatpush1.bf16.msra.mxu0 %v680_v7  ;;  %1269 = vmatpush3.bf16.msra.mxu1 %v686_v9 }
  0xa7   :  { %v798_v12 = vpop.permute.xlu0 %797  ;;  %v800_v13 = vpop.permute.xlu1 %799  ;;  %720 = vmatprep.mubr.bf16.mxu0 %v1334_v8  ;;  %1270 = vmatprep.mubr.msk.bf16.mxu1 %vm1335_vm0, %v1333_v5 }
  0xa8   :  { %v803_v15 = vsel %vm801_vm8, %v796_v11, %v798_v12  ;;  %v804_v16 = vsel %vm801_vm8, %v798_v12, %v800_v13  ;;  %1274 = vmatprep.subr.bf16.mxu1 %v1333_v5 }
  0xa9   :  { %1209 = vmatprep.subr.msk.bf16.mxu0 %vm55_vm2, %v803_v15  ;;  %v815_v19 = vsel %vm55_vm2, %v804_v16, 0 }
  0xab   :  { %v923_v20 = vpop.permute.xlu0 %922  ;;  %v925_v21 = vpop.permute.xlu1 %924 }
  0xac   :  { %v931_v24 = vsel %vm930_vm9, %v923_v20, %v925_v21 }
  0xad   :  { %1206 = vmatmul.mubr.msk.bf16.vlgmr.msra.gmra.mrb[20].mxu0 %vm51_vm3, %v1204_v17  ;;  %1271 = vmatmul.mubr.msk.bf16.vlgmr.msra.gmra.mrb[20].mxu1 %vm51_vm3, %v1204_v17  ;;  %v938_v28 = vsel %vm55_vm2, %v931_v24, 0 }
  0xae   :  { %818 = vmatpush1.bf16.msra.mxu0 %v809_v18  ;;  %1275 = vmatpush3.bf16.msra.mxu1 %v815_v19 }
  0xaf   :  { %v927_v22 = vpop.permute.xlu0 %926  ;;  %v929_v23 = vpop.permute.xlu1 %928  ;;  %849 = vmatprep.mubr.bf16.mxu0 %v1334_v8  ;;  %1276 = vmatprep.mubr.msk.bf16.mxu1 %vm1335_vm0, %v1333_v5 }
  0xb0   :  { %v932_v25 = vsel %vm930_vm9, %v925_v21, %v927_v22  ;;  %v933_v26 = vsel %vm930_vm9, %v927_v22, %v929_v23  ;;  %1280 = vmatprep.subr.bf16.mxu1 %v1333_v5 }
  0xb1   :  { %1213 = vmatprep.subr.msk.bf16.mxu0 %vm55_vm2, %v932_v25  ;;  %v944_v29 = vsel %vm55_vm2, %v933_v26, 0 }
  0xb3   :  { %v1052_v30 = vpop.permute.xlu0 %1051  ;;  %v1054_v31 = vpop.permute.xlu1 %1053 }
  0xb4   :  { %v1060_v34 = vsel %vm1059_vm10, %v1052_v30, %v1054_v31 }
  0xb5   :  { %1210 = vmatmul.mubr.msk.bf16.vlgmr.msra.gmra.mrb[24].mxu0 %vm51_vm3, %v1208_v27  ;;  %1277 = vmatmul.mubr.msk.bf16.vlgmr.msra.gmra.mrb[24].mxu1 %vm51_vm3, %v1208_v27  ;;  %v1067_v38 = vsel %vm55_vm2, %v1060_v34, 0 }
  0xb6   :  { %947 = vmatpush1.bf16.msra.mxu0 %v938_v28  ;;  %1281 = vmatpush3.bf16.msra.mxu1 %v944_v29 }
  0xb7   :  { %v1056_v32 = vpop.permute.xlu0 %1055  ;;  %v1058_v33 = vpop.permute.xlu1 %1057  ;;  %978 = vmatprep.mubr.bf16.mxu0 %v1334_v8  ;;  %1282 = vmatprep.mubr.msk.bf16.mxu1 %vm1335_vm0, %v1333_v5 }
  0xb8   :  { %v1061_v35 = vsel %vm1059_vm10, %v1054_v31, %v1056_v32  ;;  %v1062_v36 = vsel %vm1059_vm10, %v1056_v32, %v1058_v33  ;;  %1286 = vmatprep.subr.bf16.mxu1 %v1333_v5 }
  0xb9   :  { %1217 = vmatprep.subr.msk.bf16.mxu0 %vm55_vm2, %v1061_v35  ;;  %v1073_v39 = vsel %vm55_vm2, %v1062_v36, 0 }
  0xbd   :  { %1214 = vmatmul.mubr.msk.bf16.vlgmr.msra.gmra.mrb[28].mxu0 %vm51_vm3, %v1212_v37  ;;  %1283 = vmatmul.mubr.msk.bf16.vlgmr.msra.gmra.mrb[28].mxu1 %vm51_vm3, %v1212_v37 }
  0xbe   :  { %1076 = vmatpush1.bf16.msra.mxu0 %v1067_v38  ;;  %1287 = vmatpush3.bf16.msra.mxu1 %v1073_v39 }
  0xbf   :  { %1107 = vmatprep.mubr.bf16.mxu0 %v1334_v8  ;;  %1288 = vmatprep.mubr.msk.bf16.mxu1 %vm1335_vm0, %v1333_v5 }
  0xc5   :  { %1218 = vmatmul.mubr.msk.bf16.vlgmr.msra.gmra.mrb[32].mxu0 %vm51_vm3, %v1216_v40  ;;  %1289 = vmatmul.mubr.msk.bf16.vlgmr.msra.gmra.mrb[32].mxu1 %vm51_vm3, %v1216_v40 }
 0x158   :  { %v99_v41 = vpop.f32.mrb[0].mxu0  ;;  %v140_v42 = vpop.f32.mrb[0].mxu1 }
 0x159   :  { %v101_v43 = vpop.f32.mrb[1].mxu0  ;;  %v1242_v44 = vpop.f32.mrb[1].mxu1 }
 0x15a   :  { %v103_v45 = vpop.f32.mrb[2].mxu0  ;;  %v143_v46 = vpop.f32.mrb[2].mxu1 }
 0x15b   :  { %v104_v47 = vpop.f32.mrb[3].mxu0  ;;  %v1243_v48 = vpop.f32.mrb[3].mxu1 }
 0x160   :  { %v209_v8 = vpop.f32.mrb[4].mxu0  ;;  %v250_v49 = vpop.f32.mrb[4].mxu1 }
 0x161   :  { %v210_v50 = vadd.f32 %v209_v8, %v99_v41  ;;  %v251_v5 = vadd.f32 %v250_v49, %v140_v42  ;;  %v211_v51 = vpop.f32.mrb[5].mxu0  ;;  %v1248_v52 = vpop.f32.mrb[5].mxu1 }
 0x162   :  { %v212_v53 = vadd.f32 %v211_v51, %v101_v43  ;;  %v213_v54 = vpop.f32.mrb[6].mxu0  ;;  %v253_v55 = vpop.f32.mrb[6].mxu1 }
 0x163   :  { %v214_v56 = vpop.f32.mrb[7].mxu0  ;;  %v1249_v57 = vpop.f32.mrb[7].mxu1 }
 0x168   :  { %v335_v58 = vpop.f32.mrb[8].mxu0  ;;  %v376_v59 = vpop.f32.mrb[8].mxu1 }
 0x169   :  { %v382_v60 = vadd.f32 %v335_v58, %v210_v50  ;;  %v384_v61 = vadd.f32 %v376_v59, %v251_v5  ;;  %v337_v62 = vpop.f32.mrb[9].mxu0  ;;  %v1254_v63 = vpop.f32.mrb[9].mxu1 }
 0x16a   :  { %v383_v0 = vadd.f32 %v337_v62, %v212_v53  ;;  %v339_v1 = vpop.f32.mrb[10].mxu0  ;;  %v379_v2 = vpop.f32.mrb[10].mxu1 }
 0x16b   :  { %v340_v3 = vpop.f32.mrb[11].mxu0  ;;  %v1255_v4 = vpop.f32.mrb[11].mxu1 }
 0x170   :  { %v464_v6 = vpop.f32.mrb[12].mxu0  ;;  %v505_v7 = vpop.f32.mrb[12].mxu1 }
 0x171   :  { %v511_v9 = vadd.f32 %v464_v6, %v382_v60  ;;  %v513_v10 = vadd.f32 %v505_v7, %v384_v61  ;;  %v466_v11 = vpop.f32.mrb[13].mxu0  ;;  %v1260_v12 = vpop.f32.mrb[13].mxu1 }
 0x172   :  { %v512_v13 = vadd.f32 %v466_v11, %v383_v0  ;;  %v468_v14 = vpop.f32.mrb[14].mxu0  ;;  %v508_v15 = vpop.f32.mrb[14].mxu1 }
 0x173   :  { %v469_v16 = vpop.f32.mrb[15].mxu0  ;;  %v1261_v17 = vpop.f32.mrb[15].mxu1 }
 0x174   :  { %v1163_v60 = vpop.permute.xlu0 %1162 }
 0x178   :  { %v593_v18 = vpop.f32.mrb[16].mxu0  ;;  %v634_v19 = vpop.f32.mrb[16].mxu1 }
 0x179   :  { %v640_v20 = vadd.f32 %v593_v18, %v511_v9  ;;  %v642_v21 = vadd.f32 %v634_v19, %v513_v10  ;;  %v595_v22 = vpop.f32.mrb[17].mxu0  ;;  %v1266_v23 = vpop.f32.mrb[17].mxu1 }
 0x17a   :  { %v641_v24 = vadd.f32 %v595_v22, %v512_v13  ;;  %v597_v25 = vpop.f32.mrb[18].mxu0  ;;  %v637_v26 = vpop.f32.mrb[18].mxu1 }
 0x17b   :  { %v598_v27 = vpop.f32.mrb[19].mxu0  ;;  %v1267_v28 = vpop.f32.mrb[19].mxu1 }
 0x180   :  { %v722_v29 = vpop.f32.mrb[20].mxu0  ;;  %v763_v30 = vpop.f32.mrb[20].mxu1 }
 0x181   :  { %v769_v31 = vadd.f32 %v722_v29, %v640_v20  ;;  %v771_v32 = vadd.f32 %v763_v30, %v642_v21  ;;  %v724_v33 = vpop.f32.mrb[21].mxu0  ;;  %v1272_v34 = vpop.f32.mrb[21].mxu1 }
 0x182   :  { %v770_v35 = vadd.f32 %v724_v33, %v641_v24  ;;  %v726_v36 = vpop.f32.mrb[22].mxu0  ;;  %v766_v37 = vpop.f32.mrb[22].mxu1 }
 0x183   :  { %v727_v38 = vpop.f32.mrb[23].mxu0  ;;  %v1273_v39 = vpop.f32.mrb[23].mxu1 }
 0x188   :  { %v851_v40 = vpop.f32.mrb[24].mxu0  ;;  %v892_v41 = vpop.f32.mrb[24].mxu1 }
 0x189   :  { %v898_v42 = vadd.f32 %v851_v40, %v769_v31  ;;  %v900_v43 = vadd.f32 %v892_v41, %v771_v32  ;;  %v853_v44 = vpop.f32.mrb[25].mxu0  ;;  %v1278_v45 = vpop.f32.mrb[25].mxu1 }
 0x18a   :  { %v899_v46 = vadd.f32 %v853_v44, %v770_v35  ;;  %v855_v47 = vpop.f32.mrb[26].mxu0  ;;  %v895_v48 = vpop.f32.mrb[26].mxu1 }
 0x18b   :  { %v856_v8 = vpop.f32.mrb[27].mxu0  ;;  %v1279_v49 = vpop.f32.mrb[27].mxu1 }
 0x190   :  { %v980_v50 = vpop.f32.mrb[28].mxu0  ;;  %v1021_v5 = vpop.f32.mrb[28].mxu1 }
 0x191   :  { %v1027_v51 = vadd.f32 %v980_v50, %v898_v42  ;;  %v1029_v52 = vadd.f32 %v1021_v5, %v900_v43  ;;  %v982_v53 = vpop.f32.mrb[29].mxu0  ;;  %v1284_v54 = vpop.f32.mrb[29].mxu1 }
 0x192   :  { %v1028_v55 = vadd.f32 %v982_v53, %v899_v46  ;;  %v984_v56 = vpop.f32.mrb[30].mxu0  ;;  %v1024_v57 = vpop.f32.mrb[30].mxu1 }
 0x193   :  { %v985_v58 = vpop.f32.mrb[31].mxu0  ;;  %v1285_v59 = vpop.f32.mrb[31].mxu1 }
 0x198   :  { %v1109_v61 = vpop.f32.mrb[32].mxu0  ;;  %v1150_v62 = vpop.f32.mrb[32].mxu1 }
 0x199   :  { %v1156_v63 = vadd.f32 %v1109_v61, %v1027_v51  ;;  %v1158_v0 = vadd.f32 %v1150_v62, %v1029_v52  ;;  %v1111_v1 = vpop.f32.mrb[33].mxu0  ;;  %v1290_v2 = vpop.f32.mrb[33].mxu1 }
 0x19a   :  { %v1157_v3 = vadd.f32 %v1111_v1, %v1028_v55  ;;  %v1113_v4 = vpop.f32.mrb[34].mxu0  ;;  %v1153_v6 = vpop.f32.mrb[34].mxu1 }
 0x19b   :  { %v1165_v7 = vadd.f32 %v1163_v60, %v1156_v63  ;;  %v1167_v9 = vadd.f32 %v1163_v60, %v1158_v0  ;;  %v1114_v10 = vpop.f32.mrb[35].mxu0  ;;  %v1291_v11 = vpop.f32.mrb[35].mxu1 }
 0x19c   :  { %v1166_v12 = vadd.f32 %v1163_v60, %v1157_v3 }
 0x19d   :  { %1168 = vst [vmem:[#allocation2] sm:$0xff] %v1165_v7  ;;  %1170 = vst [vmem:[#allocation2 + $0x10] sm:$0xff] %v1167_v9 }
 0x19e   :  { %1169 = vst [vmem:[#allocation2 + $0x8] sm:$0xff] %v1166_v12 }
 0x19f   :  { %1319 = shalt.err (!%p1316_p4)
}
 0x1a0   :  { %s1320_s19 = scalar_lea.hbm %s1498_s3, 384 }
 0x1a1   :  { %p1321_p5 = scmp.ne.s32.totalorder %s1498_s3, %s1320_s19  ;;  %p1324_p6 = scmp.lt.u32.totalorder %s1320_s19, %s1498_s3 }
 0x1a3   :  { %p1326_p7 = pnand %p1324_p6, %p1321_p5 }
 0x1a5   :  { %1329 = shalt.err (!%p1326_p7)
}
 0x1a6   :  { %1180 = dma.vmem_to_hbm [thread:$0]  %s1178_s15, 384, %s1498_s3, [#allocation3]  }
 0x1a7   :  { %1330 = dma.done.wait [#allocation3], 384  }
 0x1a8   :  { %1331 = vsyncadd [#allocation3], 4294966912 }
 0x1a9   :  { %1184 = vsyncpa [#allocation3], 1 }

</bundles_post_ra>
